<compile_context>
chip_gen: v7x
topology: tpu7x:2x2x1
jax: 0.10.0
libtpu: 0.0.40
codegen_flags: <defaults>
</compile_context>

<pallas_src>
import math

import jax
import jax.numpy as jnp
from jax import lax
from jax.experimental import pallas as pl
from jax.experimental.pallas import tpu as pltpu

_HI = jax.lax.Precision.HIGHEST


def _self_attention_kernel(x_ref, wqkv_ref, bqkv_ref, out_ref, attn_ref):
    """Single grid step processing the whole (tiny) problem.

    x_ref    : (B*S, H)      VMEM  batch flattened into M
    wqkv_ref : (H, 3*128)    VMEM  [Wq^T*scale | Wk^T | Wv^T], each zero-padded to 128 cols
    bqkv_ref : (1, 3*128)    VMEM  [bq*scale | bk | bv], zero-padded likewise
    out_ref  : (B*S, 128)    VMEM  lane-dense; cols H..127 are zero
    attn_ref : (B, S, S)     VMEM
    """
    B, S, _ = attn_ref.shape
    L = out_ref.shape[-1]                      # 128 (lane width per fused chunk)

    # One fused QKV projection for all batches: (B*S, H) @ (H, 3*128).
    qkv = jnp.dot(x_ref[...], wqkv_ref[...],
                  preferred_element_type=jnp.float32,
                  precision=_HI) + bqkv_ref[...]                    # (B*S, 3*128)

    # Static unroll over the (tiny) batch; all slices are sublane/lane aligned.
    for b in range(B):
        r0, r1 = b * S, (b + 1) * S
        q = qkv[r0:r1, 0 * L:1 * L]            # (S, 128), scale already folded in
        k = qkv[r0:r1, 1 * L:2 * L]            # (S, 128)
        v = qkv[r0:r1, 2 * L:3 * L]            # (S, 128)

        # energy = (Q*scale) @ K^T via NT contraction (no materialized transpose).
        energy = lax.dot_general(q, k, (((1,), (1,)), ((), ())),
                                 preferred_element_type=jnp.float32,
                                 precision=_HI)                      # (S, S)

        # Numerically stable softmax; exact divide (attn is an exposed output).
        m = jnp.max(energy, axis=-1, keepdims=True)
        p = jnp.exp(energy - m)
        attn = p / jnp.sum(p, axis=-1, keepdims=True)                # (S, S)

        out = jnp.dot(attn, v, preferred_element_type=jnp.float32,
                      precision=_HI)                                 # (S, 128)

        out_ref[r0:r1, :] = out.astype(out_ref.dtype)
        attn_ref[b] = attn.astype(attn_ref.dtype)


def self_attention(x, wq, bq, wk, bk, wv, bv):
    """x: (B, S, H) f32. w*: torch-layout (H_out, H_in). Returns (out, attention)."""
    B, S, H = x.shape
    LANES = 128
    pad = LANES - H
    scale = 1.0 / math.sqrt(float(H))

    # Fuse + pre-transpose the three weights into (H, 3*128), each chunk
    # zero-padded to a 128-lane boundary; fold 1/sqrt(H) into the Q chunk.
    wqkv = jnp.concatenate([
        jnp.pad(wq.T * scale, ((0, 0), (0, pad))),
        jnp.pad(wk.T, ((0, 0), (0, pad))),
        jnp.pad(wv.T, ((0, 0), (0, pad))),
    ], axis=1)                                                       # (H, 3*128)
    bqkv = jnp.concatenate([
        jnp.pad(bq * scale, (0, pad)),
        jnp.pad(bk, (0, pad)),
        jnp.pad(bv, (0, pad)),
    ]).reshape(1, 3 * LANES)                                         # (1, 3*128)

    x2 = x.reshape(B * S, H)                   # flatten batch into matmul M dim

    grid_spec = pltpu.PrefetchScalarGridSpec(
        num_scalar_prefetch=0,
        grid=(1,),                             # single step: everything VMEM-resident
        in_specs=[
            pl.BlockSpec((B * S, H), lambda i: (0, 0)),          # x (flattened)
            pl.BlockSpec((H, 3 * LANES), lambda i: (0, 0)),      # fused Wqkv
            pl.BlockSpec((1, 3 * LANES), lambda i: (0, 0)),      # fused bias
        ],
        out_specs=[
            pl.BlockSpec((B * S, LANES), lambda i: (0, 0)),      # lane-dense out
            pl.BlockSpec((B, S, S), lambda i: (0, 0, 0)),        # attention
        ],
    )

    out_padded, attn = pl.pallas_call(
        _self_attention_kernel,
        out_shape=(
            jax.ShapeDtypeStruct((B * S, LANES), jnp.float32),
            jax.ShapeDtypeStruct((B, S, S), jnp.float32),
        ),
        grid_spec=grid_spec,
        compiler_params=pltpu.CompilerParams(
            dimension_semantics=("arbitrary",)),
    )(x2, wqkv, bqkv)

    out = out_padded[:, :H].reshape(B, S, H)   # strip zero lanes, restore (B,S,H)
    return out, attn


def _reference(x, wq, bq, wk, bk, wv, bv):
    """Pure-JAX reference mirroring the PyTorch forward (high-precision matmuls)."""
    H = x.shape[-1]
    Q = jnp.einsum("bsh,oh->bso", x, wq, precision=_HI) + bq
    K = jnp.einsum("bsh,oh->bso", x, wk, precision=_HI) + bk
    V = jnp.einsum("bsh,oh->bso", x, wv, precision=_HI) + bv
    energy = jnp.einsum("bqh,bkh->bqk", Q, K, precision=_HI) / jnp.sqrt(jnp.float32(H))
    attn = jax.nn.softmax(energy, axis=-1)
    out = jnp.einsum("bqk,bkh->bqh", attn, V, precision=_HI)
    return out, attn


if __name__ == "__main__":
    B, S, H = 2, 8, 32

    key = jax.random.PRNGKey(0)
    keys = jax.random.split(key, 7)
    bound = 1.0 / math.sqrt(H)   # torch.nn.Linear default init range

    x = jax.random.normal(keys[0], (B, S, H), dtype=jnp.float32)
    wq = jax.random.uniform(keys[1], (H, H), jnp.float32, -bound, bound)
    bq = jax.random.uniform(keys[2], (H,), jnp.float32, -bound, bound)
    wk = jax.random.uniform(keys[3], (H, H), jnp.float32, -bound, bound)
    bk = jax.random.uniform(keys[4], (H,), jnp.float32, -bound, bound)
    wv = jax.random.uniform(keys[5], (H, H), jnp.float32, -bound, bound)
    bv = jax.random.uniform(keys[6], (H,), jnp.float32, -bound, bound)

    out, attn = self_attention(x, wq, bq, wk, bk, wv, bv)
    jax.block_until_ready((out, attn))

    ref_out, ref_attn = _reference(x, wq, bq, wk, bk, wv, bv)
    assert jnp.allclose(out, ref_out, atol=1e-4, rtol=1e-4)
    assert jnp.allclose(attn, ref_attn, atol=1e-4, rtol=1e-4)

    print("KERNEL_OK")
</pallas_src>

<mosaic_0001>
module attributes {stable_mosaic.version = 11 : i64} {
  func.func @_self_attention_kernel(%arg0: i32, %arg1: memref<16x32xf32, #tpu.memory_space<vmem>>, %arg2: memref<32x384xf32, #tpu.memory_space<vmem>>, %arg3: memref<1x384xf32, #tpu.memory_space<vmem>>, %arg4: memref<16x128xf32, #tpu.memory_space<vmem>>, %arg5: memref<2x8x8xf32, #tpu.memory_space<vmem>>) attributes {dimension_semantics = [#tpu.dimension_semantics<arbitrary>], iteration_bounds = array<i64: 1>, scalar_prefetch = 0 : i64, scratch_operands = 0 : i64, tpu.core_type = #tpu.core_type<tc>, window_params = [{pipeline_mode = #tpu.pipeline_mode<synchronous>, transform_indices = @transform_0, window_bounds = array<i64: 16, 32>}, {pipeline_mode = #tpu.pipeline_mode<synchronous>, transform_indices = @transform_1, window_bounds = array<i64: 32, 384>}, {pipeline_mode = #tpu.pipeline_mode<synchronous>, transform_indices = @transform_2, window_bounds = array<i64: 1, 384>}, {pipeline_mode = #tpu.pipeline_mode<synchronous>, transform_indices = @transform_3, window_bounds = array<i64: 16, 128>}, {pipeline_mode = #tpu.pipeline_mode<synchronous>, transform_indices = @transform_4, window_bounds = array<i64: 2, 8, 8>}]} {
    %c0 = arith.constant 0 : index
    %c0_0 = arith.constant 0 : index
    %0 = vector.load %arg1[%c0, %c0_0] : memref<16x32xf32, #tpu.memory_space<vmem>>, vector<16x32xf32>
    %c0_1 = arith.constant 0 : index
    %c0_2 = arith.constant 0 : index
    %1 = vector.load %arg2[%c0_1, %c0_2] : memref<32x384xf32, #tpu.memory_space<vmem>>, vector<32x384xf32>
    %cst = arith.constant dense<0.000000e+00> : vector<16x384xf32>
    %2 = tpu.matmul %0, %1, %cst {dimension_numbers = #tpu.dot_dimension_numbers<[1], [0], [0], [1], [0, 0, 1, 1], [], []>, precision = #tpu.contract_precision<fp32>} : vector<16x32xf32>, vector<32x384xf32>, vector<16x384xf32> -> vector<16x384xf32>
    %c0_3 = arith.constant 0 : index
    %c0_4 = arith.constant 0 : index
    %3 = vector.load %arg3[%c0_3, %c0_4] : memref<1x384xf32, #tpu.memory_space<vmem>>, vector<1x384xf32>
    %4 = vector.broadcast %3 : vector<1x384xf32> to vector<16x384xf32>
    %5 = arith.addf %2, %4 : vector<16x384xf32>
    %6 = vector.extract_strided_slice %5 {offsets = [0, 0], sizes = [8, 128], strides = [1, 1]} : vector<16x384xf32> to vector<8x128xf32>
    %7 = vector.extract_strided_slice %5 {offsets = [0, 128], sizes = [8, 128], strides = [1, 1]} : vector<16x384xf32> to vector<8x128xf32>
    %8 = vector.extract_strided_slice %5 {offsets = [0, 256], sizes = [8, 128], strides = [1, 1]} : vector<16x384xf32> to vector<8x128xf32>
    %cst_5 = arith.constant dense<0.000000e+00> : vector<8x8xf32>
    %9 = tpu.matmul %6, %7, %cst_5 {dimension_numbers = #tpu.dot_dimension_numbers<[1], [1], [0], [0], [0, 0, 1, 0], [], []>, precision = #tpu.contract_precision<fp32>} : vector<8x128xf32>, vector<8x128xf32>, vector<8x8xf32> -> vector<8x8xf32>
    %cst_6 = arith.constant dense<0xFF800000> : vector<8xf32>
    %10 = vector.multi_reduction <maximumf>, %9, %cst_6 [1] : vector<8x8xf32> to vector<8xf32>
    %11 = vector.shape_cast %10 : vector<8xf32> to vector<8x1xf32>
    %12 = vector.broadcast %11 : vector<8x1xf32> to vector<8x8xf32>
    %13 = arith.subf %9, %12 : vector<8x8xf32>
    %14 = math.exp %13 : vector<8x8xf32>
    %cst_7 = arith.constant dense<0.000000e+00> : vector<8xf32>
    %15 = vector.multi_reduction <add>, %14, %cst_7 [1] : vector<8x8xf32> to vector<8xf32>
    %16 = vector.shape_cast %15 : vector<8xf32> to vector<8x1xf32>
    %17 = vector.broadcast %16 : vector<8x1xf32> to vector<8x8xf32>
    %18 = arith.divf %14, %17 : vector<8x8xf32>
    %cst_8 = arith.constant dense<0.000000e+00> : vector<8x128xf32>
    %19 = tpu.matmul %18, %8, %cst_8 {dimension_numbers = #tpu.dot_dimension_numbers<[1], [0], [0], [1], [0, 0, 1, 1], [], []>, precision = #tpu.contract_precision<fp32>} : vector<8x8xf32>, vector<8x128xf32>, vector<8x128xf32> -> vector<8x128xf32>
    %c0_9 = arith.constant 0 : index
    %c0_10 = arith.constant 0 : index
    %20 = vector.load %arg4[%c0_9, %c0_10] : memref<16x128xf32, #tpu.memory_space<vmem>>, vector<8x128xf32>
    tpu.vector_store %arg4[%c0_9, %c0_10], %19 {strides = array<i32>} : memref<16x128xf32, #tpu.memory_space<vmem>>, vector<8x128xf32>,
    %c0_11 = arith.constant 0 : index
    %c0_12 = arith.constant 0 : index
    %c0_13 = arith.constant 0 : index
    %21 = vector.load %arg5[%c0_11, %c0_12, %c0_13] : memref<2x8x8xf32, #tpu.memory_space<vmem>>, vector<1x8x8xf32>
    %22 = vector.shape_cast %21 : vector<1x8x8xf32> to vector<8x8xf32>
    %23 = vector.shape_cast %18 : vector<8x8xf32> to vector<1x8x8xf32>
    tpu.vector_store %arg5[%c0_11, %c0_12, %c0_13], %23 {strides = array<i32>} : memref<2x8x8xf32, #tpu.memory_space<vmem>>, vector<1x8x8xf32>,
    %24 = vector.extract_strided_slice %5 {offsets = [8, 0], sizes = [8, 128], strides = [1, 1]} : vector<16x384xf32> to vector<8x128xf32>
    %25 = vector.extract_strided_slice %5 {offsets = [8, 128], sizes = [8, 128], strides = [1, 1]} : vector<16x384xf32> to vector<8x128xf32>
    %26 = vector.extract_strided_slice %5 {offsets = [8, 256], sizes = [8, 128], strides = [1, 1]} : vector<16x384xf32> to vector<8x128xf32>
    %cst_14 = arith.constant dense<0.000000e+00> : vector<8x8xf32>
    %27 = tpu.matmul %24, %25, %cst_14 {dimension_numbers = #tpu.dot_dimension_numbers<[1], [1], [0], [0], [0, 0, 1, 0], [], []>, precision = #tpu.contract_precision<fp32>} : vector<8x128xf32>, vector<8x128xf32>, vector<8x8xf32> -> vector<8x8xf32>
    %cst_15 = arith.constant dense<0xFF800000> : vector<8xf32>
    %28 = vector.multi_reduction <maximumf>, %27, %cst_15 [1] : vector<8x8xf32> to vector<8xf32>
    %29 = vector.shape_cast %28 : vector<8xf32> to vector<8x1xf32>
    %30 = vector.broadcast %29 : vector<8x1xf32> to vector<8x8xf32>
    %31 = arith.subf %27, %30 : vector<8x8xf32>
    %32 = math.exp %31 : vector<8x8xf32>
    %cst_16 = arith.constant dense<0.000000e+00> : vector<8xf32>
    %33 = vector.multi_reduction <add>, %32, %cst_16 [1] : vector<8x8xf32> to vector<8xf32>
    %34 = vector.shape_cast %33 : vector<8xf32> to vector<8x1xf32>
    %35 = vector.broadcast %34 : vector<8x1xf32> to vector<8x8xf32>
    %36 = arith.divf %32, %35 : vector<8x8xf32>
    %cst_17 = arith.constant dense<0.000000e+00> : vector<8x128xf32>
    %37 = tpu.matmul %36, %26, %cst_17 {dimension_numbers = #tpu.dot_dimension_numbers<[1], [0], [0], [1], [0, 0, 1, 1], [], []>, precision = #tpu.contract_precision<fp32>} : vector<8x8xf32>, vector<8x128xf32>, vector<8x128xf32> -> vector<8x128xf32>
    %c8 = arith.constant 8 : index
    %c0_18 = arith.constant 0 : index
    %38 = vector.load %arg4[%c8, %c0_18] : memref<16x128xf32, #tpu.memory_space<vmem>>, vector<8x128xf32>
    tpu.vector_store %arg4[%c8, %c0_18], %37 {strides = array<i32>} : memref<16x128xf32, #tpu.memory_space<vmem>>, vector<8x128xf32>,
    %c1 = arith.constant 1 : index
    %c0_19 = arith.constant 0 : index
    %c0_20 = arith.constant 0 : index
    %39 = vector.load %arg5[%c1, %c0_19, %c0_20] : memref<2x8x8xf32, #tpu.memory_space<vmem>>, vector<1x8x8xf32>
    %40 = vector.shape_cast %39 : vector<1x8x8xf32> to vector<8x8xf32>
    %41 = vector.shape_cast %36 : vector<8x8xf32> to vector<1x8x8xf32>
    tpu.vector_store %arg5[%c1, %c0_19, %c0_20], %41 {strides = array<i32>} : memref<2x8x8xf32, #tpu.memory_space<vmem>>, vector<1x8x8xf32>,
    return
  }
  func.func @transform_0(%arg0: i32) -> (i32, i32) {
    %c0_i32 = arith.constant 0 : i32
    %c0_i32_0 = arith.constant 0 : i32
    %c0_i32_1 = arith.constant 0 : i32
    return %c0_i32, %c0_i32_0 : i32, i32
  }
  func.func @transform_1(%arg0: i32) -> (i32, i32) {
    %c0_i32 = arith.constant 0 : i32
    %c0_i32_0 = arith.constant 0 : i32
    %c0_i32_1 = arith.constant 0 : i32
    return %c0_i32, %c0_i32_0 : i32, i32
  }
  func.func @transform_2(%arg0: i32) -> (i32, i32) {
    %c0_i32 = arith.constant 0 : i32
    %c0_i32_0 = arith.constant 0 : i32
    %c0_i32_1 = arith.constant 0 : i32
    return %c0_i32, %c0_i32_0 : i32, i32
  }
  func.func @transform_3(%arg0: i32) -> (i32, i32) {
    %c0_i32 = arith.constant 0 : i32
    %c0_i32_0 = arith.constant 0 : i32
    %c0_i32_1 = arith.constant 0 : i32
    return %c0_i32, %c0_i32_0 : i32, i32
  }
  func.func @transform_4(%arg0: i32) -> (i32, i32, i32) {
    %c0_i32 = arith.constant 0 : i32
    %c0_i32_0 = arith.constant 0 : i32
    %c0_i32_1 = arith.constant 0 : i32
    %c0_i32_2 = arith.constant 0 : i32
    return %c0_i32, %c0_i32_0, %c0_i32_1 : i32, i32, i32
  }
}

</mosaic_0001>

<bundles_post_ra>
// kernel: tpu_custom_call.1
= control target key start
LH: loop header
LB: loop body
LE: loop exit
PB: predicated region body
PF: predicated region fallthrough
CT: control target
= control target key end

     0   :  { %10 = vsyncpa [#allocation3], 0  ;;  %s3999_s0 = inlined_call_operand.hbm [shape: f32[16,32], index: 0, kind: input, shape index: {}]   ;;  %s4000_s1 = inlined_call_operand.hbm [shape: f32[32,384], index: 1, kind: input, shape index: {}]   ;;  %s4001_s2 = inlined_call_operand.vmem [shape: f32[1,384], index: 2, kind: input, shape index: {}]   ;;  %s4002_s3 = inlined_call_operand.hbm [shape: f32[16,128], index: 3, kind: output, shape index: {0}]   ;;  %s4003_s4 = inlined_call_operand.hbm [shape: f32[2,8,8], index: 4, kind: output, shape index: {1}]  }
   0x1   :  { %11 = vsyncpa [#allocation6], 0 }
   0x2   :  { %12 = vsyncpa [#allocation4], 0 }
   0x3   :  { %13 = vsyncpa [#allocation9], 0  ;;  %s3612_s15 = smov [#allocation2]   ;;  %s3516_s19 = scalar_lea.hbm %s3999_s0, 256 }
   0x4   :  { %s19_s16 = sshll.u32 %s3612_s15, 4  ;;  %p3517_p0 = scmp.ne.s32.totalorder %s3999_s0, %s3516_s19  ;;  %s20_s16 = int_to_ptr.vmem [resolvable:$true] %s19_s16 }
   0x5   :  { %p3520_p1 = scmp.lt.u32.totalorder %s3516_s19, %s3999_s0 }
   0x7   :  { %p3522_p2 = pnand %p3520_p1, %p3517_p0 }
   0x9   :  { %3525 = shalt.err (!%p3522_p2)
}
   0xa   :  { %s3526_s24 = scalar_lea.vmem %s20_s16, 256  ;;  %p3531_p4 = scmp.lt.s32.totalorder %s20_s16, %s20_s16 }
   0xb   :  { %p3527_p3 = scmp.ne.s32.totalorder %s20_s16, %s3526_s24  ;;  %p3532_p5 = scmp.lt.s32.totalorder %s3526_s24, %s3526_s24 }
   0xd   :  { %p3533_p6 = por %p3532_p5, %p3531_p4 }
   0xf   :  { %p3534_p7 = pnand %p3533_p6, %p3527_p3 }
  0x11   :  { %3537 = shalt.err (!%p3534_p7)
}
  0x12   :  { %s3613_s25 = smov 128   ;;  %s3614_s26 = smov 8  }
  0x13   :  { %25 = dma.hbm_to_vmem [thread:$0]  %s3999_s0, 256, %s20_s16, [#allocation3], %s3613_s25, %s3613_s25, %s3614_s26  }
  0x14   :  { %s3615_s29 = smov [#allocation5]   ;;  %s3538_s7 = scalar_lea.hbm %s4000_s1, 1536 }
  0x15   :  { %s31_s30 = sshll.u32 %s3615_s29, 4  ;;  %p3539_p8 = scmp.ne.s32.totalorder %s4000_s1, %s3538_s7  ;;  %s32_s30 = int_to_ptr.vmem [resolvable:$true] %s31_s30 }
  0x16   :  { %p3542_p9 = scmp.lt.u32.totalorder %s3538_s7, %s4000_s1 }
  0x18   :  { %p3544_p10 = pnand %p3542_p9, %p3539_p8 }
  0x1a   :  { %3547 = shalt.err (!%p3544_p10)
}
  0x1b   :  { %s3548_s12 = scalar_lea.vmem %s32_s30, 1536  ;;  %p3553_p12 = scmp.lt.s32.totalorder %s32_s30, %s32_s30 }
  0x1c   :  { %p3549_p11 = scmp.ne.s32.totalorder %s32_s30, %s3548_s12  ;;  %p3554_p13 = scmp.lt.s32.totalorder %s3548_s12, %s3548_s12 }
  0x1e   :  { %p3555_p0 = por %p3554_p13, %p3553_p12 }
  0x20   :  { %p3556_p1 = pnand %p3555_p0, %p3549_p11 }
  0x22   :  { %3559 = shalt.err (!%p3556_p1)
}
  0x23   :  { %s3616_s0 = smov 384   ;;  %s3617_s13 = smov 24  }
  0x24   :  { %37 = dma.hbm_to_vmem [thread:$0]  %s4000_s1, 1536, %s32_s30, [#allocation6], %s3616_s0, %s3616_s0, %s3617_s13  }
  0x25   :  { %3604 = dma.done.wait [#allocation3], 256  }
  0x26   :  { %3605 = vsyncadd [#allocation3], 4294967040 }
  0x27   :  { %3606 = dma.done.wait [#allocation6], 1536  }
  0x28   :  { %3607 = vsyncadd [#allocation6], 4294965760  ;;  %v3618_v0 = vmov 0.0   ;;  %v49_v1 = vld [vmem:[#allocation5 + $0x8] sm:$0xff]  ;;  %v52_v2 = vld [vmem:[#allocation5 + $0x20] sm:$0xff]  ;;  %vm77_vm0 = vcmask 261120  }
  0x29   :  { %156 = vmatprep.mubr.f32.mxu0 %v3618_v0  ;;  %v48_v3 = vld [vmem:[#allocation5] sm:$0xff]  ;;  %v84_v4 = vand.u32 4294901760, %v49_v1  ;;  %v88_v5 = vand.u32 4294901760, %v52_v2  ;;  %v51_v6 = vld [vmem:[#allocation5 + $0x18] sm:$0xff]  ;;  %v58_v9 = vld [vmem:[#allocation5 + $0x50] sm:$0xff]  ;;  %vm3619_vm1 = vmmov 0  }
  0x2a   :  { %v86_v7 = vand.u32 4294901760, %v48_v3  ;;  %v55_v8 = vld [vmem:[#allocation5 + $0x38] sm:$0xff]  ;;  %v90_v10 = vand.u32 4294901760, %v51_v6  ;;  %v96_v12 = vand.u32 4294901760, %v58_v9  ;;  %v54_v13 = vld [vmem:[#allocation5 + $0x30] sm:$0xff]  ;;  %v57_v14 = vld [vmem:[#allocation5 + $0x48] sm:$0xff] }
  0x2b   :  { %v92_v11 = vand.u32 4294901760, %v55_v8  ;;  %v46_v15 = vld [vmem:[#allocation2] sm:$0xff]  ;;  %v3675_v16 = vpack.c.bf16 %v88_v5, %v84_v4  ;;  %v3677_v17 = vsub.f32 %v49_v1, %v84_v4  ;;  %v3679_v18 = vsub.f32 %v52_v2, %v88_v5  ;;  %v47_v32 = vld [vmem:[#allocation2 + $0x8] sm:$0xff]  ;;  %v53_v4 = vld [vmem:[#allocation5 + $0x28] sm:$0xff] }
  0x2c   :  { %v3681_v19 = vsub.f32 %v48_v3, %v86_v7  ;;  %v3683_v20 = vpack.c.bf16 %v90_v10, %v86_v7  ;;  %v3685_v21 = vsub.f32 %v51_v6, %v90_v10  ;;  %v3692_v24 = vsub.f32 %v58_v9, %v96_v12  ;;  %v50_v1 = vld [vmem:[#allocation5 + $0x10] sm:$0xff]  ;;  %v56_v5 = vld [vmem:[#allocation5 + $0x40] sm:$0xff] }
  0x2d   :  { %v3687_v22 = vpack.c.bf16 %v96_v12, %v92_v11  ;;  %v3689_v23 = vsub.f32 %v55_v8, %v92_v11  ;;  %3327 = vmatprep.subr.bf16.mxu0 %v3675_v16  ;;  %v94_v25 = vand.u32 4294901760, %v54_v13  ;;  %v98_v26 = vand.u32 4294901760, %v57_v14  ;;  %v59_v8 = vld [vmem:[#allocation5 + $0x58] sm:$0xff] }
  0x2e   :  { %v79_v27 = vsel %vm77_vm0, %v46_v15, 0  ;;  %3329 = vmatpush1.bf16.msra.mxu0 %v3683_v20  ;;  %v181_v29 = vand.u32 4294901760, %v3677_v17  ;;  %v193_v30 = vand.u32 4294901760, %v3679_v18  ;;  %v187_v31 = vand.u32 4294901760, %v3681_v19 }
  0x2f   :  { %v3696_v28 = vand.u32 4294901760, %v79_v27  ;;  %3331 = vmatprep.subr.bf16.mxu0 %v3687_v22  ;;  %v3702_v33 = vpack.c.bf16 %v98_v26, %v94_v25  ;;  %v3704_v34 = vsub.f32 %v54_v13, %v94_v25  ;;  %v3706_v35 = vsub.f32 %v57_v14, %v98_v26 }
  0x30   :  { %v199_v36 = vand.u32 4294901760, %v3685_v21  ;;  %v182_v38 = vsub.f32 %v3677_v17, %v181_v29  ;;  %v194_v39 = vsub.f32 %v3679_v18, %v193_v30  ;;  %v188_v40 = vsub.f32 %v3681_v19, %v187_v31 }
  0x31   :  { %v3710_v37 = vsub.f32 %v79_v27, %v3696_v28  ;;  %v82_v42 = vsel %vm77_vm0, %v47_v32, 0  ;;  %v205_v43 = vand.u32 4294901760, %v3689_v23  ;;  %v217_v44 = vand.u32 4294901760, %v3692_v24 }
  0x32   :  { %v200_v41 = vsub.f32 %v3685_v21, %v199_v36  ;;  %3333 = vmatpush1.bf16.msra.mxu0 %v3702_v33  ;;  %v183_v46 = vand.u32 4294901760, %v182_v38  ;;  %v195_v47 = vand.u32 4294901760, %v194_v39  ;;  %v189_v48 = vand.u32 4294901760, %v188_v40 }
  0x33   :  { %v3729_v45 = vand.u32 4294901760, %v3710_v37  ;;  %v3731_v50 = vand.u32 4294901760, %v82_v42  ;;  %v206_v51 = vsub.f32 %v3689_v23, %v205_v43  ;;  %v218_v52 = vsub.f32 %v3692_v24, %v217_v44 }
  0x34   :  { %v201_v49 = vand.u32 4294901760, %v200_v41  ;;  %v3334_v54 = vpack.c.bf16 %v195_v47, %v183_v46  ;;  %v211_v55 = vand.u32 4294901760, %v3704_v34  ;;  %v223_v56 = vand.u32 4294901760, %v3706_v35 }
  0x35   :  { %v160_v53 = vsub.f32 %v3710_v37, %v3729_v45  ;;  %v3744_v58 = vsub.f32 %v82_v42, %v3731_v50  ;;  %v207_v59 = vand.u32 4294901760, %v206_v51  ;;  %v219_v60 = vand.u32 4294901760, %v218_v52 }
  0x36   :  { %v3336_v57 = vpack.c.bf16 %v201_v49, %v189_v48  ;;  %3335 = vmatprep.subr.bf16.mxu0 %v3334_v54  ;;  %v212_v62 = vsub.f32 %v3704_v34, %v211_v55  ;;  %v224_v63 = vsub.f32 %v3706_v35, %v223_v56  ;;  %v677_v10 = vand.u32 4294901760, %v50_v1 }
  0x37   :  { %v161_v61 = vand.u32 4294901760, %v160_v53  ;;  %v3753_v2 = vand.u32 4294901760, %v3744_v58  ;;  %v3338_v3 = vpack.c.bf16 %v219_v60, %v207_v59  ;;  %v680_v12 = vand.u32 4294901760, %v53_v4 }
  0x38   :  { %v213_v6 = vand.u32 4294901760, %v212_v62  ;;  %v225_v7 = vand.u32 4294901760, %v224_v63  ;;  %v683_v13 = vand.u32 4294901760, %v56_v5  ;;  %v3342_v15 = vpack.c.bf16 %v3679_v18, %v3677_v17 }
  0x39   :  { %162 = vmatmul.mubr.f32.vlgmr.msra.gmra.mrb[0].mxu0 %v161_v61  ;;  %3148 = vmatprep.mubr.f32.mxu1 %v161_v61  ;;  %v171_v9 = vsub.f32 %v3744_v58, %v3753_v2  ;;  %v686_v25 = vand.u32 4294901760, %v59_v8  ;;  %v3760_v26 = vsub.f32 %v50_v1, %v677_v10  ;;  %v3762_v27 = vpack.c.bf16 %v680_v12, %v677_v10 }
  0x3a   :  { %3337 = vmatpush1.bf16.msra.mxu0 %v3336_v57  ;;  %167 = vmatprep.mubr.f32.mxu0 %v3618_v0  ;;  %v3340_v11 = vpack.c.bf16 %v225_v7, %v213_v6  ;;  %v3764_v32 = vsub.f32 %v53_v4, %v680_v12  ;;  %v3766_v38 = vsub.f32 %v56_v5, %v683_v13  ;;  %vm1650_vm2 = vcmask 64512  }
  0x3b   :  { %3339 = vmatprep.subr.bf16.mxu0 %v3338_v3  ;;  %v172_v14 = vand.u32 4294901760, %v171_v9  ;;  %v3768_v39 = vpack.c.bf16 %v686_v25, %v683_v13  ;;  %v768_v40 = vand.u32 4294901760, %v3760_v26  ;;  %v3771_v41 = vsub.f32 %v59_v8, %v686_v25  ;;  %3375 = vmatprep.subr.bf16.mxu1 %v3762_v27 }
  0x3c   :  { %v3344_v42 = vpack.c.bf16 %v3685_v21, %v3681_v19  ;;  %v775_v46 = vand.u32 4294901760, %v3764_v32  ;;  %v782_v47 = vand.u32 4294901760, %v3766_v38  ;;  %v3346_v48 = vpack.c.bf16 %v3692_v24, %v3689_v23  ;;  %3377 = vmatpush3.bf16.msra.mxu1 %v3762_v27  ;;  %v60_v24 = vld [vmem:[%s4001_s2] sm:$0x7]  ;;  %s3620_s2 = smov [#allocation8]  }
  0x3d   :  { %173 = vmatmul.mubr.f32.gmra.mrb[2].mxu0 %v172_v14  ;;  %v769_v49 = vsub.f32 %v3760_v26, %v768_v40  ;;  %v789_v51 = vand.u32 4294901760, %v3771_v41  ;;  %3379 = vmatprep.subr.bf16.mxu1 %v3768_v39  ;;  %v3348_v59 = vpack.c.bf16 %v3706_v35, %v3704_v34  ;;  %v3358_v3 = vpack.c.bf16 %v193_v30, %v181_v29  ;;  %s3039_s17 = sshll.u32 %s3620_s2, 4  ;;  %s3040_s17 = int_to_ptr.vmem [resolvable:$true] %s3039_s17 }
  0x3e   :  { %3341 = vmatpush1.bf16.msra.mxu0 %v3340_v11  ;;  %283 = vmatprep.mubr.f32.mxu0 %v3618_v0  ;;  %v776_v52 = vsub.f32 %v3764_v32, %v775_v46  ;;  %v783_v53 = vsub.f32 %v3766_v38, %v782_v47  ;;  %v3390_v4 = vpack.c.bf16 %v3764_v32, %v3760_v26  ;;  %v62_v21 = vlaneseq  ;;  %s3560_s18 = scalar_lea.vmem %s3040_s17, 256  ;;  %p3565_p3 = scmp.lt.s32.totalorder %s3040_s17, %s3040_s17 }
  0x3f   :  { %3343 = vmatprep.subr.bf16.mxu0 %v3342_v15  ;;  %v770_v54 = vand.u32 4294901760, %v769_v49  ;;  %v790_v57 = vsub.f32 %v3771_v41, %v789_v51  ;;  %v3360_v5 = vpack.c.bf16 %v199_v36, %v187_v31  ;;  %v3362_v17 = vpack.c.bf16 %v217_v44, %v205_v43  ;;  %p3561_p2 = scmp.ne.s32.totalorder %s3040_s17, %s3560_s18  ;;  %p3566_p4 = scmp.lt.s32.totalorder %s3560_s18, %s3560_s18 }
  0x40   :  { %v777_v60 = vand.u32 4294901760, %v776_v52  ;;  %v784_v61 = vand.u32 4294901760, %v783_v53  ;;  %3381 = vmatpush3.bf16.msra.mxu1 %v3768_v39  ;;  %v3394_v18 = vpack.c.bf16 %v3771_v41, %v3766_v38  ;;  %v3364_v19 = vpack.c.bf16 %v223_v56, %v211_v55 }
  0x41   :  { %285 = vmatmul.mubr.f32.vlgmr.msra.gmra.mrb[0].mxu0 %v3696_v28  ;;  %v791_v62 = vand.u32 4294901760, %v790_v57  ;;  %p3567_p5 = por %p3566_p4, %p3565_p3 }
  0x42   :  { %3345 = vmatpush1.bf16.msra.mxu0 %v3344_v42  ;;  %290 = vmatprep.mubr.f32.mxu0 %v3618_v0  ;;  %v3382_v63 = vpack.c.bf16 %v777_v60, %v770_v54 }
  0x43   :  { %3347 = vmatprep.subr.bf16.mxu0 %v3346_v48  ;;  %3149 = vmatmul.mubr.f32.vlgmr.msra.gmra.mrb[0].mxu1 %v172_v14  ;;  %v3386_v1 = vpack.c.bf16 %v791_v62, %v784_v61  ;;  %p3568_p6 = pnand %p3567_p5, %p3561_p2 }
  0x44   :  { %3383 = vmatprep.subr.bf16.mxu1 %v3382_v63  ;;  %3159 = vmatprep.mubr.f32.mxu1 %v3696_v28 }
  0x45   :  { %292 = vmatmul.mubr.f32.gmra.mrb[2].mxu0 %v3731_v50  ;;  %3385 = vmatpush3.bf16.msra.mxu1 %v3382_v63 }
  0x46   :  { %3349 = vmatpush1.bf16.msra.mxu0 %v3348_v59  ;;  %378 = vmatprep.mubr.f32.mxu0 %v3618_v0 }
  0x47   :  { %3351 = vmatprep.subr.bf16.mxu0 %v3675_v16  ;;  %3387 = vmatprep.subr.bf16.mxu1 %v3386_v1 }
  0x49   :  { %381 = vmatmul.mubr.f32.vlgmr.msra.gmra.mrb[0].mxu0 %v3710_v37  ;;  %3389 = vmatpush3.bf16.msra.mxu1 %v3386_v1 }
  0x4a   :  { %3353 = vmatpush1.bf16.msra.mxu0 %v3683_v20  ;;  %386 = vmatprep.mubr.f32.mxu0 %v3618_v0 }
  0x4b   :  { %3355 = vmatprep.subr.bf16.mxu0 %v3687_v22  ;;  %3391 = vmatprep.subr.bf16.mxu1 %v3390_v4 }
  0x4c   :  { %3160 = vmatmul.mubr.f32.vlgmr.msra.gmra.mrb[0].mxu1 %v3731_v50 }
  0x4d   :  { %389 = vmatmul.mubr.f32.gmra.mrb[2].mxu0 %v3744_v58  ;;  %3393 = vmatpush3.bf16.msra.mxu1 %v3390_v4 }
  0x4e   :  { %3357 = vmatpush1.bf16.msra.mxu0 %v3702_v33  ;;  %467 = vmatprep.mubr.f32.mxu0 %v3618_v0 }
  0x4f   :  { %3359 = vmatprep.subr.bf16.mxu0 %v3358_v3  ;;  %3395 = vmatprep.subr.bf16.mxu1 %v3394_v18 }
  0x50   :  { %3170 = vmatprep.mubr.f32.mxu1 %v3710_v37 }
  0x51   :  { %471 = vmatmul.mubr.f32.vlgmr.msra.gmra.mrb[0].mxu0 %v3729_v45  ;;  %3397 = vmatpush3.bf16.msra.mxu1 %v3394_v18 }
  0x52   :  { %3361 = vmatpush1.bf16.msra.mxu0 %v3360_v5  ;;  %476 = vmatprep.mubr.f32.mxu0 %v3618_v0 }
  0x53   :  { %3363 = vmatprep.subr.bf16.mxu0 %v3362_v17  ;;  %3399 = vmatprep.subr.bf16.mxu1 %v3762_v27 }
  0x54   :  { %3171 = vmatmul.mubr.f32.vlgmr.msra.gmra.mrb[0].mxu1 %v3744_v58 }
  0x55   :  { %480 = vmatmul.mubr.f32.gmra.mrb[2].mxu0 %v3753_v2  ;;  %3401 = vmatpush3.bf16.msra.mxu1 %v3762_v27 }
  0x56   :  { %3365 = vmatpush1.bf16.msra.mxu0 %v3364_v19  ;;  %574 = vmatprep.mubr.f32.mxu0 %v3618_v0 }
  0x57   :  { %3367 = vmatprep.subr.bf16.mxu0 %v3675_v16  ;;  %3403 = vmatprep.subr.bf16.mxu1 %v3768_v39  ;;  %v3406_v16 = vpack.c.bf16 %v775_v46, %v768_v40 }
  0x58   :  { %3181 = vmatprep.mubr.f32.mxu1 %v3729_v45 }
  0x59   :  { %576 = vmatmul.mubr.f32.vlgmr.msra.gmra.mrb[0].mxu0 %v3696_v28  ;;  %3405 = vmatpush3.bf16.msra.mxu1 %v3768_v39 }
  0x5a   :  { %3369 = vmatpush1.bf16.msra.mxu0 %v3683_v20  ;;  %581 = vmatprep.mubr.f32.mxu0 %v3618_v0  ;;  %v3410_v20 = vpack.c.bf16 %v789_v51, %v782_v47 }
  0x5b   :  { %3371 = vmatprep.subr.bf16.mxu0 %v3687_v22  ;;  %3407 = vmatprep.subr.bf16.mxu1 %v3406_v16  ;;  %v63_v22 = vshrl.u32 %v62_v21, 7 }
  0x5c   :  { %3182 = vmatmul.mubr.f32.vlgmr.msra.gmra.mrb[0].mxu1 %v3753_v2 }
  0x5d   :  { %583 = vmatmul.mubr.f32.gmra.mrb[2].mxu0 %v3731_v50  ;;  %3409 = vmatpush3.bf16.msra.mxu1 %v3406_v16  ;;  %v64_v23 = vsub.s32 0, %v63_v22  ;;  %v72_v58 = vsub.s32 2, %v63_v22 }
  0x5e   :  { %3373 = vmatpush1.bf16.msra.mxu0 %v3702_v33  ;;  %661 = vmatprep.mubr.f32.mxu0 %v3618_v0 }
  0x5f   :  { %3236 = vmatprep.subr.mxu0 %v3618_v0  ;;  %3411 = vmatprep.subr.bf16.mxu1 %v3410_v20  ;;  %v65_v29 = vrot.slane %v60_v24, %v64_v23  ;;  %v73_v9 = vrot.slane %v60_v24, %v72_v58 }
  0x60   :  { %3192 = vmatprep.mubr.f32.mxu1 %v3696_v28 }
  0x61   :  { %663 = vmatmul.mubr.f32.vlgmr.msra.gmra.mrb[0].mxu0 %v3696_v28  ;;  %3413 = vmatpush3.bf16.msra.mxu1 %v3410_v20 }
  0x62   :  { %668 = vmatprep.mubr.f32.mxu0 %v3618_v0  ;;  %3415 = vmatprep.subr.bf16.mxu1 %v3762_v27 }
  0x64   :  { %3193 = vmatmul.mubr.f32.vlgmr.msra.gmra.mrb[0].mxu1 %v3731_v50 }
  0x65   :  { %670 = vmatmul.mubr.f32.gmra.mrb[2].mxu0 %v3731_v50  ;;  %3417 = vmatpush3.bf16.msra.mxu1 %v3762_v27 }
  0x66   :  { %3203 = vmatprep.mubr.f32.mxu1 %v3696_v28  ;;  %3419 = vmatprep.subr.bf16.mxu1 %v3768_v39  ;;  %v68_v28 = vsub.s32 1, %v63_v22 }
  0x67   :  { %3238 = vmatprep.mubr.msk.f32.mxu0 %vm3619_vm1, %v3618_v0 }
  0x68   :  { %v69_v30 = vrot.slane %v60_v24, %v68_v28 }
  0x69   :  { %3421 = vmatpush3.bf16.msra.mxu1 %v3768_v39 }
  0x6a   :  { %3206 = vmatprep.subr.mxu1 %v3618_v0 }
  0x6c   :  { %3204 = vmatmul.mubr.f32.vlgmr.msra.gmra.mrb[0].mxu1 %v3731_v50 }
  0x6d   :  { %3208 = vmatprep.mubr.msk.f32.mxu1 %vm3619_vm1, %v3618_v0 }
 0x134   :  { %v664_v31 = vpop.f32.mrb[0].mxu0 }
 0x135   :  { %v3422_v33 = vadd.f32 %v664_v31, %v65_v29  ;;  %v666_v34 = vpop.f32.mrb[1].mxu0 }
 0x136   :  { %v3423_v35 = vadd.f32 %v666_v34, %v69_v30 }
 0x137   :  { %v1270_v36 = vand.u32 4294901760, %v3422_v33 }
 0x138   :  { %v1205_v37 = vand.u32 4294901760, %v3423_v35  ;;  %v671_v43 = vpop.f32.mrb[2].mxu0 }
 0x139   :  { %v1271_v44 = vsub.f32 %v3422_v33, %v1270_v36  ;;  %v673_v45 = vpop.f32.mrb[3].mxu0  ;;  %v3424_v15 = vadd.f32 %v671_v43, %v65_v29 }
 0x13a   :  { %v1282_v50 = vsub.f32 %v3423_v35, %v1205_v37  ;;  %3207 = vmatpush3.xpose.msra.mxu1 %v1205_v37  ;;  %v3425_v25 = vadd.f32 %v673_v45, %v69_v30 }
 0x13b   :  { %v1272_v55 = vand.u32 4294901760, %v1271_v44  ;;  %3211 = vmatprep.subr.mxu1 %v3618_v0  ;;  %v2179_v26 = vand.u32 4294901760, %v3424_v15 }
 0x13c   :  { %v1283_v56 = vand.u32 4294901760, %v1282_v50  ;;  %v2114_v27 = vand.u32 4294901760, %v3425_v25 }
 0x13d   :  { %v1273_v2 = vsub.f32 %v1271_v44, %v1272_v55  ;;  %v2180_v32 = vsub.f32 %v3424_v15, %v2179_v26 }
 0x13e   :  { %v1284_v6 = vsub.f32 %v1282_v50, %v1283_v56  ;;  %v2191_v38 = vsub.f32 %v3425_v25, %v2114_v27 }
 0x13f   :  { %v1274_v7 = vand.u32 4294901760, %v1273_v2  ;;  %v3205_v10 = vpop.f32.mrb[0].mxu1  ;;  %v2181_v39 = vand.u32 4294901760, %v2180_v32 }
 0x140   :  { %v1285_v8 = vand.u32 4294901760, %v1284_v6  ;;  %v3885_v11 = vadd.f32 %v3205_v10, %v73_v9  ;;  %v1194_v12 = vpop.f32.mrb[1].mxu1  ;;  %v2192_v40 = vand.u32 4294901760, %v2191_v38 }
 0x141   :  { %3209 = vmatmul.mubr.f32.vlgmr.msra.gmra.mrb[2].mxu1 %v1274_v7  ;;  %v3887_v13 = vadd.f32 %v1194_v12, %v73_v9  ;;  %v2182_v41 = vsub.f32 %v2180_v32, %v2181_v39 }
 0x142   :  { %3212 = vmatpush3.xpose.msra.mxu1 %v1285_v8  ;;  %3213 = vmatprep.mubr.msk.f32.mxu1 %vm3619_vm1, %v3618_v0  ;;  %v2193_v42 = vsub.f32 %v2191_v38, %v2192_v40  ;;  %v2574_v34 = vand.u32 4294901760, %v3885_v11 }
 0x143   :  { %3216 = vmatprep.subr.mxu1 %v3618_v0  ;;  %v3890_v14 = vand.u32 4294901760, %v3887_v13  ;;  %v2183_v46 = vand.u32 4294901760, %v2182_v41 }
 0x144   :  { %v2194_v47 = vand.u32 4294901760, %v2193_v42 }
 0x145   :  { %3237 = vmatpush3.msra.mxu0 %v3890_v14  ;;  %v1743_v19 = vsub.f32 %v3887_v13, %v3890_v14 }
 0x146   :  { %3241 = vmatprep.subr.mxu0 %v3618_v0 }
 0x147   :  { %v1744_v22 = vand.u32 4294901760, %v1743_v19 }
 0x149   :  { %3214 = vmatmul.mubr.f32.vlgmr.msra.gmra.mrb[2].mxu1 %v1270_v36  ;;  %v1745_v28 = vsub.f32 %v1743_v19, %v1744_v22 }
 0x14a   :  { %3217 = vmatpush3.xpose.msra.mxu1 %v1282_v50  ;;  %3218 = vmatprep.mubr.msk.f32.mxu1 %vm3619_vm1, %v3618_v0 }
 0x14b   :  { %3221 = vmatprep.subr.mxu1 %v3618_v0  ;;  %v1746_v31 = vand.u32 4294901760, %v1745_v28 }
 0x151   :  { %3219 = vmatmul.mubr.f32.vlgmr.msra.gmra.mrb[2].mxu1 %v1271_v44 }
 0x152   :  { %3222 = vmatpush3.xpose.msra.mxu1 %v1205_v37  ;;  %3223 = vmatprep.mubr.msk.f32.mxu1 %vm3619_vm1, %v3618_v0 }
 0x153   :  { %3226 = vmatprep.subr.mxu1 %v3618_v0 }
 0x159   :  { %3224 = vmatmul.mubr.f32.vlgmr.msra.gmra.mrb[2].mxu1 %v1272_v55 }
 0x15a   :  { %3227 = vmatpush3.xpose.msra.mxu1 %v1283_v56  ;;  %3228 = vmatprep.mubr.msk.f32.mxu1 %vm3619_vm1, %v3618_v0 }
 0x15b   :  { %3231 = vmatprep.subr.mxu1 %v3618_v0 }
 0x161   :  { %3229 = vmatmul.mubr.f32.vlgmr.msra.gmra.mrb[2].mxu1 %v1270_v36 }
 0x162   :  { %3232 = vmatpush3.xpose.msra.mxu1 %v1205_v37  ;;  %3233 = vmatprep.mubr.msk.f32.mxu1 %vm3619_vm1, %v3618_v0 }
 0x163   :  { %3266 = vmatprep.subr.mxu1 %v3618_v0 }
 0x169   :  { %3234 = vmatmul.mubr.f32.vlgmr.msra.gmra.mrb[2].mxu1 %v1270_v36  ;;  %v2651_v36 = vsub.f32 %v3885_v11, %v2574_v34 }
 0x16a   :  { %3267 = vmatpush3.xpose.msra.mxu1 %v2114_v27  ;;  %3268 = vmatprep.mubr.msk.f32.mxu1 %vm3619_vm1, %v3618_v0 }
 0x16b   :  { %3271 = vmatprep.subr.mxu1 %v3618_v0  ;;  %v2652_v45 = vand.u32 4294901760, %v2651_v36 }
 0x16d   :  { %3269 = vmatmul.mubr.f32.vlgmr.msra.gmra.mrb[4].mxu1 %v2183_v46  ;;  %v2653_v56 = vsub.f32 %v2651_v36, %v2652_v45 }
 0x16e   :  { %3272 = vmatpush3.xpose.msra.mxu1 %v2194_v47  ;;  %3273 = vmatprep.mubr.msk.f32.mxu1 %vm3619_vm1, %v3618_v0 }
 0x16f   :  { %3276 = vmatprep.subr.mxu1 %v3618_v0  ;;  %v2654_v6 = vand.u32 4294901760, %v2653_v56 }
 0x175   :  { %3274 = vmatmul.mubr.f32.vlgmr.msra.gmra.mrb[4].mxu1 %v2179_v26 }
 0x176   :  { %3277 = vmatpush3.xpose.msra.mxu1 %v2191_v38  ;;  %3278 = vmatprep.mubr.msk.f32.mxu1 %vm3619_vm1, %v3618_v0 }
 0x177   :  { %3281 = vmatprep.subr.mxu1 %v3618_v0 }
 0x17d   :  { %3279 = vmatmul.mubr.f32.vlgmr.msra.gmra.mrb[4].mxu1 %v2180_v32 }
 0x17e   :  { %3282 = vmatpush3.xpose.msra.mxu1 %v2114_v27  ;;  %3283 = vmatprep.mubr.msk.f32.mxu1 %vm3619_vm1, %v3618_v0 }
 0x17f   :  { %3286 = vmatprep.subr.mxu1 %v3618_v0 }
 0x185   :  { %3284 = vmatmul.mubr.f32.vlgmr.msra.gmra.mrb[4].mxu1 %v2181_v39 }
 0x186   :  { %3287 = vmatpush3.xpose.msra.mxu1 %v2192_v40  ;;  %3288 = vmatprep.mubr.msk.f32.mxu1 %vm3619_vm1, %v3618_v0 }
 0x187   :  { %3291 = vmatprep.subr.mxu1 %v3618_v0 }
 0x18d   :  { %3289 = vmatmul.mubr.f32.vlgmr.msra.gmra.mrb[4].mxu1 %v2179_v26 }
 0x18e   :  { %3292 = vmatpush3.xpose.msra.mxu1 %v2114_v27  ;;  %3293 = vmatprep.mubr.msk.f32.mxu1 %vm3619_vm1, %v3618_v0 }
 0x195   :  { %3294 = vmatmul.mubr.f32.vlgmr.msra.gmra.mrb[4].mxu1 %v2179_v26 }
 0x23c   :  { %v1646_v48 = vpop.f32.mrb[2].mxu1 }
 0x23d   :  { %v3235_v49 = vpop.f32.mrb[3].mxu1  ;;  %v1651_v51 = vsel %vm1650_vm2, %v1646_v48, -inf }
 0x23e   :  { %1652 = vmax.xlane.f32.xlu0 %v1651_v51 }
 0x268   :  { %v2555_v52 = vpop.f32.mrb[4].mxu1 }
 0x269   :  { %v3295_v53 = vpop.f32.mrb[5].mxu1  ;;  %v2559_v54 = vsel %vm1650_vm2, %v2555_v52, -inf }
 0x26a   :  { %2560 = vmax.xlane.f32.xlu0 %v2559_v54 }
 0x2cb   :  { %v1653_v57 = vpop.xlane.xlu0 %1652 }
 0x2cc   :  { %v1654_v59 = vsub.f32 %v1646_v48, %v1653_v57 }
 0x2ce   :  { %v1655_v60 = vmul.f32 1.442695, %v1654_v59 }
 0x2d0   :  { %3508 = vpow2.f32 %v1655_v60 }
 0x2da   :  { %v3509_v61 = vpop.eup %3508 }
 0x2db   :  { %v1657_v62 = vsel %vm1650_vm2, %v3509_v61, 0.0 }
 0x2dc   :  { %1658 = vadd.xlane.f32.xlu1 %v1657_v62 }
 0x2f7   :  { %v2561_v63 = vpop.xlane.xlu0 %2560 }
 0x2f8   :  { %v2562_v1 = vsub.f32 %v2555_v52, %v2561_v63 }
 0x2fa   :  { %v2563_v3 = vmul.f32 1.442695, %v2562_v1 }
 0x2fc   :  { %3510 = vpow2.f32 %v2563_v3 }
 0x306   :  { %v3511_v4 = vpop.eup %3510 }
 0x307   :  { %v2565_v5 = vsel %vm1650_vm2, %v3511_v4, 0.0 }
 0x308   :  { %2566 = vadd.xlane.f32.xlu1 %v2565_v5 }
 0x369   :  { %v1659_v17 = vpop.xlane.xlu1 %1658 }
 0x36a   :  { %3512 = vrcp.f32 %v1659_v17 }
 0x374   :  { %v3513_v18 = vpop.eup %3512 }
 0x375   :  { %v1661_v16 = vmul.f32 %v3513_v18, %v3509_v61 }
 0x377   :  { %v1663_v20 = vsel %vm1650_vm2, %v1661_v16, 0  ;;  %2112 = vst.msk [vmem:[#allocation8] sm:$0xff] %vm1650_vm2, %v1661_v16 }
 0x378   :  { %v1731_v21 = vand.u32 4294901760, %v1663_v20 }
 0x37a   :  { %v1732_v23 = vsub.f32 %v1663_v20, %v1731_v21 }
 0x37c   :  { %v1733_v24 = vand.u32 4294901760, %v1732_v23 }
 0x37e   :  { %v1734_v29 = vsub.f32 %v1732_v23, %v1733_v24 }
 0x380   :  { %v1735_v30 = vand.u32 4294901760, %v1734_v29 }
 0x382   :  { %3239 = vmatmul.mubr.f32.vlgmr.msra.gmra.mrb[4].mxu0 %v1735_v30 }
 0x383   :  { %3242 = vmatpush3.msra.mxu0 %v1746_v31  ;;  %3243 = vmatprep.mubr.msk.f32.mxu0 %vm3619_vm1, %v3618_v0 }
 0x384   :  { %3246 = vmatprep.subr.mxu0 %v3618_v0 }
 0x38a   :  { %3244 = vmatmul.mubr.f32.vlgmr.msra.gmra.mrb[4].mxu0 %v1731_v21 }
 0x38b   :  { %3247 = vmatpush3.msra.mxu0 %v1743_v19  ;;  %3248 = vmatprep.mubr.msk.f32.mxu0 %vm3619_vm1, %v3618_v0 }
 0x38c   :  { %3251 = vmatprep.subr.mxu0 %v3618_v0 }
 0x392   :  { %3249 = vmatmul.mubr.f32.vlgmr.msra.gmra.mrb[4].mxu0 %v1732_v23 }
 0x393   :  { %3252 = vmatpush3.msra.mxu0 %v3890_v14  ;;  %3253 = vmatprep.mubr.msk.f32.mxu0 %vm3619_vm1, %v3618_v0 }
 0x394   :  { %3256 = vmatprep.subr.mxu0 %v3618_v0 }
 0x395   :  { %v2567_v33 = vpop.xlane.xlu1 %2566 }
 0x396   :  { %3514 = vrcp.f32 %v2567_v33 }
 0x39a   :  { %3254 = vmatmul.mubr.f32.vlgmr.msra.gmra.mrb[4].mxu0 %v1733_v24 }
 0x39b   :  { %3257 = vmatpush3.msra.mxu0 %v1744_v22  ;;  %3258 = vmatprep.mubr.msk.f32.mxu0 %vm3619_vm1, %v3618_v0 }
 0x39c   :  { %3261 = vmatprep.subr.mxu0 %v3618_v0 }
 0x3a0   :  { %v3515_v35 = vpop.eup %3514 }
 0x3a1   :  { %v2569_v37 = vmul.f32 %v3515_v35, %v3511_v4 }
 0x3a2   :  { %3259 = vmatmul.mubr.f32.vlgmr.msra.gmra.mrb[4].mxu0 %v1731_v21 }
 0x3a3   :  { %v2571_v43 = vsel %vm1650_vm2, %v2569_v37, 0  ;;  %3021 = vst.msk [vmem:[#allocation8 + $0x8] sm:$0xff] %vm1650_vm2, %v2569_v37  ;;  %3262 = vmatpush3.msra.mxu0 %v3890_v14  ;;  %3263 = vmatprep.mubr.msk.f32.mxu0 %vm3619_vm1, %v3618_v0 }
 0x3a4   :  { %v2639_v44 = vand.u32 4294901760, %v2571_v43  ;;  %3296 = vmatprep.subr.mxu0 %v3618_v0 }
 0x3a6   :  { %v2640_v50 = vsub.f32 %v2571_v43, %v2639_v44 }
 0x3a8   :  { %v2641_v55 = vand.u32 4294901760, %v2640_v50 }
 0x3aa   :  { %3264 = vmatmul.mubr.f32.vlgmr.msra.gmra.mrb[4].mxu0 %v1731_v21  ;;  %v2642_v58 = vsub.f32 %v2640_v50, %v2641_v55 }
 0x3ab   :  { %3297 = vmatpush3.msra.mxu0 %v2574_v34  ;;  %3298 = vmatprep.mubr.msk.f32.mxu0 %vm3619_vm1, %v3618_v0 }
 0x3ac   :  { %3301 = vmatprep.subr.mxu0 %v3618_v0  ;;  %v2643_v2 = vand.u32 4294901760, %v2642_v58 }
 0x3ae   :  { %3299 = vmatmul.mubr.f32.vlgmr.msra.gmra.mrb[6].mxu0 %v2643_v2 }
 0x3af   :  { %3302 = vmatpush3.msra.mxu0 %v2654_v6  ;;  %3303 = vmatprep.mubr.msk.f32.mxu0 %vm3619_vm1, %v3618_v0 }
 0x3b0   :  { %3306 = vmatprep.subr.mxu0 %v3618_v0 }
 0x3b6   :  { %3304 = vmatmul.mubr.f32.vlgmr.msra.gmra.mrb[6].mxu0 %v2639_v44 }
 0x3b7   :  { %3307 = vmatpush3.msra.mxu0 %v2651_v36  ;;  %3308 = vmatprep.mubr.msk.f32.mxu0 %vm3619_vm1, %v3618_v0 }
 0x3b8   :  { %3311 = vmatprep.subr.mxu0 %v3618_v0 }
 0x3be   :  { %3309 = vmatmul.mubr.f32.vlgmr.msra.gmra.mrb[6].mxu0 %v2640_v50 }
 0x3bf   :  { %3312 = vmatpush3.msra.mxu0 %v2574_v34  ;;  %3313 = vmatprep.mubr.msk.f32.mxu0 %vm3619_vm1, %v3618_v0 }
 0x3c0   :  { %3316 = vmatprep.subr.mxu0 %v3618_v0 }
 0x3c6   :  { %3314 = vmatmul.mubr.f32.vlgmr.msra.gmra.mrb[6].mxu0 %v2641_v55 }
 0x3c7   :  { %3317 = vmatpush3.msra.mxu0 %v2652_v45  ;;  %3318 = vmatprep.mubr.msk.f32.mxu0 %vm3619_vm1, %v3618_v0 }
 0x3c8   :  { %3321 = vmatprep.subr.mxu0 %v3618_v0 }
 0x3ce   :  { %3319 = vmatmul.mubr.f32.vlgmr.msra.gmra.mrb[6].mxu0 %v2639_v44 }
 0x3cf   :  { %3322 = vmatpush3.msra.mxu0 %v2574_v34  ;;  %3323 = vmatprep.mubr.msk.f32.mxu0 %vm3619_vm1, %v3618_v0 }
 0x3d6   :  { %3324 = vmatmul.mubr.f32.vlgmr.msra.gmra.mrb[6].mxu0 %v2639_v44 }
 0x3d7   :  { %3571 = shalt.err (!%p3568_p6)
}
 0x3d8   :  { %s3572_s21 = scalar_lea.hbm %s4003_s4, 256 }
 0x3d9   :  { %p3573_p7 = scmp.ne.s32.totalorder %s4003_s4, %s3572_s21  ;;  %p3576_p8 = scmp.lt.u32.totalorder %s3572_s21, %s4003_s4 }
 0x3db   :  { %p3578_p9 = pnand %p3576_p8, %p3573_p7 }
 0x3dd   :  { %3581 = shalt.err (!%p3578_p9)
}
 0x3de   :  { %3045 = dma.vmem_to_hbm [thread:$0]  %s3040_s17, 256, %s4003_s4, [#allocation9], %s3613_s25, %s3613_s25, %s3614_s26  }
 0x3df   :  { %s3621_s30 = smov [#allocation7]  }
 0x3e0   :  { %s3027_s5 = sshll.u32 %s3621_s30, 4  ;;  %s3028_s5 = int_to_ptr.vmem [resolvable:$true] %s3027_s5 }
 0x3e1   :  { %s3582_s6 = scalar_lea.vmem %s3028_s5, 256  ;;  %p3587_p11 = scmp.lt.s32.totalorder %s3028_s5, %s3028_s5 }
 0x3e2   :  { %p3583_p10 = scmp.ne.s32.totalorder %s3028_s5, %s3582_s6  ;;  %p3588_p12 = scmp.lt.s32.totalorder %s3582_s6, %s3582_s6 }
 0x3e4   :  { %p3589_p13 = por %p3588_p12, %p3587_p11 }
 0x3e6   :  { %p3590_p0 = pnand %p3589_p13, %p3583_p10 }
 0x47d   :  { %v2107_v0 = vpop.f32.mrb[4].mxu0 }
 0x47e   :  { %2111 = vst [vmem:[#allocation7] sm:$0xff] %v2107_v0  ;;  %v3265_v7 = vpop.f32.mrb[5].mxu0 }
 0x4a9   :  { %v3015_v8 = vpop.f32.mrb[6].mxu0 }
 0x4aa   :  { %3019 = vst [vmem:[#allocation7 + $0x8] sm:$0xff] %v3015_v8  ;;  %v3325_v9 = vpop.f32.mrb[7].mxu0 }
 0x4ab   :  { %3593 = shalt.err (!%p3590_p0)
}
 0x4ac   :  { %s3594_s4 = scalar_lea.hbm %s4002_s3, 256 }
 0x4ad   :  { %p3595_p1 = scmp.ne.s32.totalorder %s4002_s3, %s3594_s4  ;;  %p3598_p2 = scmp.lt.u32.totalorder %s3594_s4, %s4002_s3 }
 0x4af   :  { %p3600_p3 = pnand %p3598_p2, %p3595_p1 }
 0x4b1   :  { %3603 = shalt.err (!%p3600_p3)
}
 0x4b2   :  { %3033 = dma.vmem_to_hbm [thread:$0]  %s3028_s5, 256, %s4002_s3, [#allocation4], %s3613_s25, %s3613_s25, %s3614_s26  }
 0x4b3   :  { %3608 = dma.done.wait [#allocation4], 256  }
 0x4b4   :  { %3609 = vsyncadd [#allocation4], 4294967040 }
 0x4b5   :  { %3610 = dma.done.wait [#allocation9], 256  }
 0x4b6   :  { %3611 = vsyncadd [#allocation9], 4294967040 }
 0x4b7   :  { %3052 = vsyncpa [#allocation3], 1 }
 0x4b8   :  { %3053 = vsyncpa [#allocation6], 1 }
 0x4b9   :  { %3054 = vsyncpa [#allocation4], 1 }
 0x4ba   :  { %3055 = vsyncpa [#allocation9], 1 }

</bundles_post_ra>
